<compile_context>
chip_gen: v7x
topology: tpu7x:2x2x1
jax: 0.10.0
libtpu: 0.0.40
codegen_flags: <defaults>
</compile_context>

<pallas_src>
import functools

import jax
import jax.numpy as jnp
from jax.experimental import pallas as pl
from jax.experimental.pallas import tpu as pltpu


# ----------------------------------------------------------------------------
# Kernel
# ----------------------------------------------------------------------------
def _softplus(x):
    # Branch-free, numerically stable softplus.  Matches
    # torch.nn.Softplus(beta=1, threshold=20) to <3e-9 in f32: for x > 20,
    # log1p(exp(-x)) < 2.1e-9 so the result is x to fp32 precision.
    return jnp.maximum(x, 0.0) + jnp.log1p(jnp.exp(-jnp.abs(x)))


def _mlp_kernel(x_ref,
                w1_ref, b1_ref,
                w2_ref, b2_ref,
                w3_ref, b3_ref,
                w4_ref, b4_ref,
                o_ref, *, act_dtype):
    """One batch tile through all four layers.

    MXU operand dtype follows the weights (f32 or bf16, set in the wrapper);
    accumulation is always f32 via preferred_element_type.  Biases are f32 and
    added to the f32 accumulator.  Softplus runs in `act_dtype` (bf16 on chips
    with a bf16 VPU/EUP, f32 otherwise).
    """
    cdt = w1_ref.dtype

    def linear(h, w_ref, b_ref):
        acc = jnp.dot(h, w_ref[...], preferred_element_type=jnp.float32)
        return acc + b_ref[...]          # f32 bias, f32 accumulator

    h = x_ref[...]
    h = _softplus(linear(h, w1_ref, b1_ref).astype(act_dtype)).astype(cdt)
    h = _softplus(linear(h, w2_ref, b2_ref).astype(act_dtype)).astype(cdt)
    h = _softplus(linear(h, w3_ref, b3_ref).astype(act_dtype)).astype(cdt)
    o_ref[...] = linear(h, w4_ref, b4_ref).astype(o_ref.dtype)


# ----------------------------------------------------------------------------
# Wrapper
# ----------------------------------------------------------------------------
def _round_up(n, m):
    return ((n + m - 1) // m) * m


def _chip_kind():
    try:
        return jax.devices()[0].device_kind.lower()
    except Exception:  # pragma: no cover - e.g. no devices during tracing
        return ""


def _dtype_policy(precision, kind):
    """Returns (mxu_operand_dtype, activation_dtype)."""
    if precision == "f32":
        return jnp.float32, jnp.float32
    if precision == "bf16":            # bf16 operands AND bf16 Softplus
        return jnp.bfloat16, jnp.bfloat16
    if precision == "mixed":           # bf16 MXU operands, f32 Softplus
        return jnp.bfloat16, jnp.float32
    if precision == "auto":
        if "v6" in kind or "v7" in kind:   # bf16 VPU/EUP available
            return jnp.bfloat16, jnp.bfloat16
        return jnp.bfloat16, jnp.float32   # v5e & older: bf16 MXU only
    raise ValueError(f"unknown precision: {precision!r}")


def _resident_spec(arr):
    # Whole-array block with a constant index_map: stays VMEM-resident across
    # all grid steps (Pallas revisits the block, no per-step re-DMA).
    nd = arr.ndim
    return pl.BlockSpec(arr.shape, lambda i, _nd=nd: (0,) * _nd)


@functools.partial(jax.jit, static_argnames=("tile_m", "precision"))
def model_latent_f(x, params, tile_m=1024, precision="auto"):
    """Forward pass of ModelLatentF.

    x:       (N, x_in)
    params:  dict with w1..w4 of shape (in, out) and b1..b4 of shape (1, out)
             (PyTorch nn.Linear weights pre-transposed so the kernel does
              x @ W + b on the MXU).
    returns: (N, x_out) float32
    """
    N, x_in = x.shape
    Hdim = params["w1"].shape[1]
    x_out = params["w4"].shape[1]

    kind = _chip_kind()
    compute_dtype, act_dtype = _dtype_policy(precision, kind)
    itemsize = jnp.dtype(compute_dtype).itemsize

    # ---- batch tiling ------------------------------------------------------
    # Row multiple keeps sublane packing unmasked (8 for f32, 16 for bf16).
    row_mult = 16 if itemsize == 2 else 8
    n_round = _round_up(max(N, 1), row_mult)
    tm = min(int(tile_m), n_round)
    # v7x has 2 TensorCores per chip: make sure the batch grid has >= 2 steps
    # so dimension_semantics=("parallel",) can shard it across both cores.
    if "v7" in kind and n_round > row_mult:
        tm = min(tm, _round_up(pl.cdiv(n_round, 2), row_mult))
    tm = max(row_mult, (tm // row_mult) * row_mult)
    n_pad = _round_up(N, tm)

    # ---- wrapper-side dtype conversion (cuts HBM bytes before the DMA) -----
    xp = x.astype(compute_dtype)
    if n_pad != N:
        xp = jnp.pad(xp, ((0, n_pad - N), (0, 0)))
    w1 = params["w1"].astype(compute_dtype)
    w2 = params["w2"].astype(compute_dtype)
    w3 = params["w3"].astype(compute_dtype)
    w4 = params["w4"].astype(compute_dtype)
    b1 = params["b1"].astype(jnp.float32)
    b2 = params["b2"].astype(jnp.float32)
    b3 = params["b3"].astype(jnp.float32)
    b4 = params["b4"].astype(jnp.float32)

    grid = (n_pad // tm,)

    in_specs = [
        pl.BlockSpec((tm, x_in), lambda i: (i, 0)),
        _resident_spec(w1), _resident_spec(b1),
        _resident_spec(w2), _resident_spec(b2),
        _resident_spec(w3), _resident_spec(b3),
        _resident_spec(w4), _resident_spec(b4),
    ]
    # Unpadded output columns: block last-dim == full array dim (16) is legal;
    # masked stores cost far less than 8x the HBM writeback of a 128-col pad.
    out_spec = pl.BlockSpec((tm, x_out), lambda i: (i, 0))

    weight_elems = x_in * Hdim + 2 * Hdim * Hdim + Hdim * x_out
    cost = pl.CostEstimate(
        flops=2 * n_pad * weight_elems,
        transcendentals=2 * 3 * n_pad * Hdim,           # exp + log1p per act
        bytes_accessed=(n_pad * x_in * itemsize         # input
                        + weight_elems * itemsize       # weights
                        + (3 * Hdim + x_out) * 4        # f32 biases
                        + n_pad * x_out * 4))           # f32 output

    out = pl.pallas_call(
        functools.partial(_mlp_kernel, act_dtype=act_dtype),
        out_shape=jax.ShapeDtypeStruct((n_pad, x_out), jnp.float32),
        grid_spec=pltpu.PrefetchScalarGridSpec(
            num_scalar_prefetch=0,
            grid=grid,
            in_specs=in_specs,
            out_specs=out_spec,
        ),
        compiler_params=pltpu.CompilerParams(
            dimension_semantics=("parallel",),
        ),
        cost_estimate=cost,
    )(xp, w1, b1, w2, b2, w3, b3, w4, b4)

    return out if n_pad == N else out[:N]


# ----------------------------------------------------------------------------
# Param init + pure-JAX reference
# ----------------------------------------------------------------------------
def init_params(key, x_in, H, x_out):
    """Mirror torch.nn.Linear defaults: U(-1/sqrt(fan_in), 1/sqrt(fan_in)) for
    weight and bias.  Weights stored as (in, out) so the kernel does x @ W + b."""
    dims = [(x_in, H), (H, H), (H, H), (H, x_out)]
    params = {}
    for idx, (fan_in, fan_out) in enumerate(dims, start=1):
        key, kw, kb = jax.random.split(key, 3)
        bound = 1.0 / jnp.sqrt(jnp.float32(fan_in))
        params[f"w{idx}"] = jax.random.uniform(
            kw, (fan_in, fan_out), jnp.float32, -bound, bound)
        params[f"b{idx}"] = jax.random.uniform(
            kb, (1, fan_out), jnp.float32, -bound, bound)
    return params


def _reference(x, params):
    """Plain-JAX f32 reference for correctness checking."""
    h = x
    for idx in range(1, 4):
        h = _softplus(h @ params[f"w{idx}"] + params[f"b{idx}"])
    return h @ params["w4"] + params["b4"]


# ----------------------------------------------------------------------------
if __name__ == "__main__":
    # Small shapes consistent with the module: x_in=32, H=64, x_out=16.
    X_IN, H, X_OUT = 32, 64, 16

    key = jax.random.PRNGKey(0)
    key, kx1, kx2, kx3 = jax.random.split(key, 4)
    params = init_params(key, X_IN, H, X_OUT)

    # 1) f32 reference configuration, small aligned batch.
    x1 = jax.random.normal(kx1, (16, X_IN), jnp.float32)
    out1 = jax.block_until_ready(model_latent_f(x1, params, precision="f32"))
    ref1 = _reference(x1, params)
    assert out1.shape == (16, X_OUT)
    assert jnp.allclose(out1, ref1, atol=1e-5, rtol=1e-5), "mismatch (f32 aligned)"

    # 2) ragged batch -> exercises the batch-padding path.
    x2 = jax.random.normal(kx2, (13, X_IN), jnp.float32)
    out2 = jax.block_until_ready(model_latent_f(x2, params, precision="f32"))
    ref2 = _reference(x2, params)
    assert out2.shape == (13, X_OUT)
    assert jnp.allclose(out2, ref2, atol=1e-5, rtol=1e-5), "mismatch (f32 ragged)"

    # 3) multi-step grid (small tile forces several batch tiles).
    x3 = jax.random.normal(kx3, (300, X_IN), jnp.float32)
    out3 = jax.block_until_ready(
        model_latent_f(x3, params, tile_m=128, precision="f32"))
    ref3 = _reference(x3, params)
    assert out3.shape == (300, X_OUT)
    assert jnp.allclose(out3, ref3, atol=1e-5, rtol=1e-5), "mismatch (f32 multi-tile)"

    # 4) low-precision fast path: bf16 operands from the wrapper
    #    (+ bf16 Softplus on v6e/v7x).  Looser tolerance per bf16 rounding.
    out4 = jax.block_until_ready(model_latent_f(x1, params, precision="auto"))
    assert out4.shape == (16, X_OUT)
    assert bool(jnp.all(jnp.isfinite(out4)))
    assert jnp.allclose(out4, ref1, atol=1e-1, rtol=1e-1), "mismatch (bf16 path)"

    print("KERNEL_OK")
</pallas_src>

<mosaic_0001>
module attributes {stable_mosaic.version = 11 : i64} {
  func.func @_mlp_kernel(%arg0: i32, %arg1: memref<16x32xf32, #tpu.memory_space<vmem>>, %arg2: memref<32x64xf32, #tpu.memory_space<vmem>>, %arg3: memref<1x64xf32, #tpu.memory_space<vmem>>, %arg4: memref<64x64xf32, #tpu.memory_space<vmem>>, %arg5: memref<1x64xf32, #tpu.memory_space<vmem>>, %arg6: memref<64x64xf32, #tpu.memory_space<vmem>>, %arg7: memref<1x64xf32, #tpu.memory_space<vmem>>, %arg8: memref<64x16xf32, #tpu.memory_space<vmem>>, %arg9: memref<1x16xf32, #tpu.memory_space<vmem>>, %arg10: memref<16x16xf32, #tpu.memory_space<vmem>>) attributes {dimension_semantics = [#tpu.dimension_semantics<parallel>], iteration_bounds = array<i64: 1>, scalar_prefetch = 0 : i64, scratch_operands = 0 : i64, tpu.core_type = #tpu.core_type<tc>, window_params = [{transform_indices = @transform_0, window_bounds = array<i64: 16, 32>}, {pipeline_mode = #tpu.pipeline_mode<synchronous>, transform_indices = @transform_1, window_bounds = array<i64: 32, 64>}, {pipeline_mode = #tpu.pipeline_mode<synchronous>, transform_indices = @transform_2, window_bounds = array<i64: 1, 64>}, {pipeline_mode = #tpu.pipeline_mode<synchronous>, transform_indices = @transform_3, window_bounds = array<i64: 64, 64>}, {pipeline_mode = #tpu.pipeline_mode<synchronous>, transform_indices = @transform_4, window_bounds = array<i64: 1, 64>}, {pipeline_mode = #tpu.pipeline_mode<synchronous>, transform_indices = @transform_5, window_bounds = array<i64: 64, 64>}, {pipeline_mode = #tpu.pipeline_mode<synchronous>, transform_indices = @transform_6, window_bounds = array<i64: 1, 64>}, {pipeline_mode = #tpu.pipeline_mode<synchronous>, transform_indices = @transform_7, window_bounds = array<i64: 64, 16>}, {pipeline_mode = #tpu.pipeline_mode<synchronous>, transform_indices = @transform_8, window_bounds = array<i64: 1, 16>}, {transform_indices = @transform_9, window_bounds = array<i64: 16, 16>}]} {
    %c0 = arith.constant 0 : index
    %c0_0 = arith.constant 0 : index
    %0 = vector.load %arg1[%c0, %c0_0] : memref<16x32xf32, #tpu.memory_space<vmem>>, vector<16x32xf32>
    %c0_1 = arith.constant 0 : index
    %c0_2 = arith.constant 0 : index
    %1 = vector.load %arg2[%c0_1, %c0_2] : memref<32x64xf32, #tpu.memory_space<vmem>>, vector<32x64xf32>
    %cst = arith.constant dense<0.000000e+00> : vector<16x64xf32>
    %2 = tpu.matmul %0, %1, %cst {dimension_numbers = #tpu.dot_dimension_numbers<[1], [0], [0], [1], [0, 0, 1, 1], [], []>} : vector<16x32xf32>, vector<32x64xf32>, vector<16x64xf32> -> vector<16x64xf32>
    %c0_3 = arith.constant 0 : index
    %c0_4 = arith.constant 0 : index
    %3 = vector.load %arg3[%c0_3, %c0_4] : memref<1x64xf32, #tpu.memory_space<vmem>>, vector<1x64xf32>
    %4 = vector.broadcast %3 : vector<1x64xf32> to vector<16x64xf32>
    %5 = arith.addf %2, %4 : vector<16x64xf32>
    %cst_5 = arith.constant 0.000000e+00 : f32
    %6 = vector.broadcast %cst_5 : f32 to vector<16x64xf32>
    %7 = arith.maximumf %5, %6 : vector<16x64xf32>
    %8 = math.absf %5 : vector<16x64xf32>
    %cst_6 = arith.constant 0.000000e+00 : f32
    %9 = vector.broadcast %cst_6 : f32 to vector<16x64xf32>
    %10 = arith.subf %9, %8 : vector<16x64xf32>
    %11 = math.exp %10 : vector<16x64xf32>
    %12 = math.log1p %11 : vector<16x64xf32>
    %13 = arith.addf %7, %12 : vector<16x64xf32>
    %c0_7 = arith.constant 0 : index
    %c0_8 = arith.constant 0 : index
    %14 = vector.load %arg4[%c0_7, %c0_8] : memref<64x64xf32, #tpu.memory_space<vmem>>, vector<64x64xf32>
    %cst_9 = arith.constant dense<0.000000e+00> : vector<16x64xf32>
    %15 = tpu.matmul %13, %14, %cst_9 {dimension_numbers = #tpu.dot_dimension_numbers<[1], [0], [0], [1], [0, 0, 1, 1], [], []>} : vector<16x64xf32>, vector<64x64xf32>, vector<16x64xf32> -> vector<16x64xf32>
    %c0_10 = arith.constant 0 : index
    %c0_11 = arith.constant 0 : index
    %16 = vector.load %arg5[%c0_10, %c0_11] : memref<1x64xf32, #tpu.memory_space<vmem>>, vector<1x64xf32>
    %17 = vector.broadcast %16 : vector<1x64xf32> to vector<16x64xf32>
    %18 = arith.addf %15, %17 : vector<16x64xf32>
    %cst_12 = arith.constant 0.000000e+00 : f32
    %19 = vector.broadcast %cst_12 : f32 to vector<16x64xf32>
    %20 = arith.maximumf %18, %19 : vector<16x64xf32>
    %21 = math.absf %18 : vector<16x64xf32>
    %cst_13 = arith.constant 0.000000e+00 : f32
    %22 = vector.broadcast %cst_13 : f32 to vector<16x64xf32>
    %23 = arith.subf %22, %21 : vector<16x64xf32>
    %24 = math.exp %23 : vector<16x64xf32>
    %25 = math.log1p %24 : vector<16x64xf32>
    %26 = arith.addf %20, %25 : vector<16x64xf32>
    %c0_14 = arith.constant 0 : index
    %c0_15 = arith.constant 0 : index
    %27 = vector.load %arg6[%c0_14, %c0_15] : memref<64x64xf32, #tpu.memory_space<vmem>>, vector<64x64xf32>
    %cst_16 = arith.constant dense<0.000000e+00> : vector<16x64xf32>
    %28 = tpu.matmul %26, %27, %cst_16 {dimension_numbers = #tpu.dot_dimension_numbers<[1], [0], [0], [1], [0, 0, 1, 1], [], []>} : vector<16x64xf32>, vector<64x64xf32>, vector<16x64xf32> -> vector<16x64xf32>
    %c0_17 = arith.constant 0 : index
    %c0_18 = arith.constant 0 : index
    %29 = vector.load %arg7[%c0_17, %c0_18] : memref<1x64xf32, #tpu.memory_space<vmem>>, vector<1x64xf32>
    %30 = vector.broadcast %29 : vector<1x64xf32> to vector<16x64xf32>
    %31 = arith.addf %28, %30 : vector<16x64xf32>
    %cst_19 = arith.constant 0.000000e+00 : f32
    %32 = vector.broadcast %cst_19 : f32 to vector<16x64xf32>
    %33 = arith.maximumf %31, %32 : vector<16x64xf32>
    %34 = math.absf %31 : vector<16x64xf32>
    %cst_20 = arith.constant 0.000000e+00 : f32
    %35 = vector.broadcast %cst_20 : f32 to vector<16x64xf32>
    %36 = arith.subf %35, %34 : vector<16x64xf32>
    %37 = math.exp %36 : vector<16x64xf32>
    %38 = math.log1p %37 : vector<16x64xf32>
    %39 = arith.addf %33, %38 : vector<16x64xf32>
    %c0_21 = arith.constant 0 : index
    %c0_22 = arith.constant 0 : index
    %40 = vector.load %arg8[%c0_21, %c0_22] : memref<64x16xf32, #tpu.memory_space<vmem>>, vector<64x16xf32>
    %cst_23 = arith.constant dense<0.000000e+00> : vector<16x16xf32>
    %41 = tpu.matmul %39, %40, %cst_23 {dimension_numbers = #tpu.dot_dimension_numbers<[1], [0], [0], [1], [0, 0, 1, 1], [], []>} : vector<16x64xf32>, vector<64x16xf32>, vector<16x16xf32> -> vector<16x16xf32>
    %c0_24 = arith.constant 0 : index
    %c0_25 = arith.constant 0 : index
    %42 = vector.load %arg9[%c0_24, %c0_25] : memref<1x16xf32, #tpu.memory_space<vmem>>, vector<1x16xf32>
    %43 = vector.broadcast %42 : vector<1x16xf32> to vector<16x16xf32>
    %44 = arith.addf %41, %43 : vector<16x16xf32>
    %c0_26 = arith.constant 0 : index
    %c0_27 = arith.constant 0 : index
    %45 = vector.load %arg10[%c0_26, %c0_27] : memref<16x16xf32, #tpu.memory_space<vmem>>, vector<16x16xf32>
    tpu.vector_store %arg10[%c0_26, %c0_27], %44 {strides = array<i32>} : memref<16x16xf32, #tpu.memory_space<vmem>>, vector<16x16xf32>,
    return
  }
  func.func @transform_0(%arg0: i32) -> (i32, i32) {
    %c0_i32 = arith.constant 0 : i32
    %c0_i32_0 = arith.constant 0 : i32
    return %arg0, %c0_i32 : i32, i32
  }
  func.func @transform_1(%arg0: i32) -> (i32, i32) {
    %c0_i32 = arith.constant 0 : i32
    %c0_i32_0 = arith.constant 0 : i32
    %c0_i32_1 = arith.constant 0 : i32
    return %c0_i32, %c0_i32_0 : i32, i32
  }
  func.func @transform_2(%arg0: i32) -> (i32, i32) {
    %c0_i32 = arith.constant 0 : i32
    %c0_i32_0 = arith.constant 0 : i32
    %c0_i32_1 = arith.constant 0 : i32
    return %c0_i32, %c0_i32_0 : i32, i32
  }
  func.func @transform_3(%arg0: i32) -> (i32, i32) {
    %c0_i32 = arith.constant 0 : i32
    %c0_i32_0 = arith.constant 0 : i32
    %c0_i32_1 = arith.constant 0 : i32
    return %c0_i32, %c0_i32_0 : i32, i32
  }
  func.func @transform_4(%arg0: i32) -> (i32, i32) {
    %c0_i32 = arith.constant 0 : i32
    %c0_i32_0 = arith.constant 0 : i32
    %c0_i32_1 = arith.constant 0 : i32
    return %c0_i32, %c0_i32_0 : i32, i32
  }
  func.func @transform_5(%arg0: i32) -> (i32, i32) {
    %c0_i32 = arith.constant 0 : i32
    %c0_i32_0 = arith.constant 0 : i32
    %c0_i32_1 = arith.constant 0 : i32
    return %c0_i32, %c0_i32_0 : i32, i32
  }
  func.func @transform_6(%arg0: i32) -> (i32, i32) {
    %c0_i32 = arith.constant 0 : i32
    %c0_i32_0 = arith.constant 0 : i32
    %c0_i32_1 = arith.constant 0 : i32
    return %c0_i32, %c0_i32_0 : i32, i32
  }
  func.func @transform_7(%arg0: i32) -> (i32, i32) {
    %c0_i32 = arith.constant 0 : i32
    %c0_i32_0 = arith.constant 0 : i32
    %c0_i32_1 = arith.constant 0 : i32
    return %c0_i32, %c0_i32_0 : i32, i32
  }
  func.func @transform_8(%arg0: i32) -> (i32, i32) {
    %c0_i32 = arith.constant 0 : i32
    %c0_i32_0 = arith.constant 0 : i32
    %c0_i32_1 = arith.constant 0 : i32
    return %c0_i32, %c0_i32_0 : i32, i32
  }
  func.func @transform_9(%arg0: i32) -> (i32, i32) {
    %c0_i32 = arith.constant 0 : i32
    %c0_i32_0 = arith.constant 0 : i32
    return %arg0, %c0_i32 : i32, i32
  }
}

</mosaic_0001>

<bundles_post_ra>
// kernel: model_latent_f.1
= control target key start
LH: loop header
LB: loop body
LE: loop exit
PB: predicated region body
PF: predicated region fallthrough
CT: control target
= control target key end

     0   :  { %14 = vsyncpa [#allocation3], 0  ;;  %s1007_s0 = inlined_call_operand.hbm [shape: f32[16,32], index: 0, kind: input, shape index: {}]   ;;  %s1008_s1 = inlined_call_operand.vmem [shape: f32[32,64], index: 1, kind: input, shape index: {}]   ;;  %s1009_s2 = inlined_call_operand.vmem [shape: f32[1,64], index: 2, kind: input, shape index: {}]   ;;  %s1010_s3 = inlined_call_operand.vmem [shape: f32[64,64], index: 3, kind: input, shape index: {}]   ;;  %s1011_s4 = inlined_call_operand.vmem [shape: f32[1,64], index: 4, kind: input, shape index: {}]   ;;  %s1012_s5 = inlined_call_operand.hbm [shape: f32[64,64], index: 5, kind: input, shape index: {}]   ;;  %s1013_s6 = inlined_call_operand.vmem [shape: f32[1,64], index: 6, kind: input, shape index: {}]   ;;  %s1014_s7 = inlined_call_operand.vmem [shape: f32[64,16], index: 7, kind: input, shape index: {}]   ;;  %s1015_s8 = inlined_call_operand.vmem [shape: f32[1,16], index: 8, kind: input, shape index: {}]   ;;  %s1016_s9 = inlined_call_operand.hbm [shape: f32[16,16], index: 9, kind: output, shape index: {}]  }
   0x1   :  { %15 = vsyncpa [#allocation6], 0 }
   0x2   :  { %16 = vsyncpa [#allocation4], 0  ;;  %s829_s30 = smov [#allocation2]   ;;  %s757_s13 = scalar_lea.hbm %s1007_s0, 256 }
   0x3   :  { %s22_s10 = sshll.u32 %s829_s30, 4  ;;  %p758_p0 = scmp.ne.s32.totalorder %s1007_s0, %s757_s13  ;;  %s23_s10 = int_to_ptr.vmem [resolvable:$true] %s22_s10 }
   0x4   :  { %p761_p1 = scmp.lt.u32.totalorder %s757_s13, %s1007_s0 }
   0x6   :  { %p763_p2 = pnand %p761_p1, %p758_p0 }
   0x8   :  { %766 = shalt.err (!%p763_p2)
}
   0x9   :  { %s767_s18 = scalar_lea.vmem %s23_s10, 256  ;;  %p772_p4 = scmp.lt.s32.totalorder %s23_s10, %s23_s10 }
   0xa   :  { %p768_p3 = scmp.ne.s32.totalorder %s23_s10, %s767_s18  ;;  %p773_p5 = scmp.lt.s32.totalorder %s767_s18, %s767_s18 }
   0xc   :  { %p774_p6 = por %p773_p5, %p772_p4 }
   0xe   :  { %p775_p7 = pnand %p774_p6, %p768_p3 }
  0x10   :  { %778 = shalt.err (!%p775_p7)
}
  0x11   :  { %s830_s19 = smov 128   ;;  %s831_s20 = smov 8  }
  0x12   :  { %28 = dma.hbm_to_vmem [thread:$0]  %s1007_s0, 256, %s23_s10, [#allocation3], %s830_s19, %s830_s19, %s831_s20  }
  0x13   :  { %s832_s23 = smov [#allocation5]   ;;  %s779_s27 = scalar_lea.hbm %s1012_s5, 1024 }
  0x14   :  { %s42_s24 = sshll.u32 %s832_s23, 4  ;;  %p780_p8 = scmp.ne.s32.totalorder %s1012_s5, %s779_s27  ;;  %s43_s24 = int_to_ptr.vmem [resolvable:$true] %s42_s24 }
  0x15   :  { %p783_p9 = scmp.lt.u32.totalorder %s779_s27, %s1012_s5 }
  0x17   :  { %p785_p10 = pnand %p783_p9, %p780_p8 }
  0x19   :  { %788 = shalt.err (!%p785_p10)
}
  0x1a   :  { %s789_s12 = scalar_lea.vmem %s43_s24, 1024  ;;  %p794_p12 = scmp.lt.s32.totalorder %s43_s24, %s43_s24 }
  0x1b   :  { %p790_p11 = scmp.ne.s32.totalorder %s43_s24, %s789_s12  ;;  %p795_p13 = scmp.lt.s32.totalorder %s789_s12, %s789_s12 }
  0x1d   :  { %p796_p0 = por %p795_p13, %p794_p12 }
  0x1f   :  { %p797_p1 = pnand %p796_p0, %p790_p11 }
  0x21   :  { %800 = shalt.err (!%p797_p1)
}
  0x22   :  { %48 = dma.hbm_to_vmem [thread:$0]  %s1012_s5, 1024, %s43_s24, [#allocation6], %s830_s19, %s830_s19, %s831_s20  }
  0x23   :  { %823 = dma.done.wait [#allocation3], 256  }
  0x24   :  { %824 = vsyncadd [#allocation3], 4294967040 }
  0x25   :  { %825 = dma.done.wait [#allocation6], 1024  }
  0x26   :  { %826 = vsyncadd [#allocation6], 4294966272  ;;  %vm74_vm0 = vcmask 261120   ;;  %v63_v0 = vld [vmem:[%s1008_s1] sm:$0xff]  ;;  %v64_v1 = vld [vmem:[%s1008_s1 + $0x8] sm:$0xff]  ;;  %vm201_vm3 = vcmask 523264  }
  0x27   :  { %v65_v2 = vld [vmem:[%s1008_s1 + $0x10] sm:$0xff]  ;;  %v672_v3 = vpack.c.bf16 %v64_v1, %v63_v0  ;;  %v66_v4 = vld [vmem:[%s1008_s1 + $0x18] sm:$0xff]  ;;  %v61_v5 = vld [vmem:[#allocation2] sm:$0xff]  ;;  %s833_s10 = smov [#allocation7]   ;;  %vm535_vm8 = vcmask 130048  }
  0x28   :  { %v676_v6 = vpack.c.bf16 %v66_v4, %v65_v2  ;;  %612 = vmatprep.mubr.msk.f32.mxu0 %vm74_vm0, %v61_v5  ;;  %v62_v7 = vld [vmem:[#allocation2 + $0x8] sm:$0xff]  ;;  %v186_v8 = vld [vmem:[%s1010_s3] sm:$0xff]  ;;  %v188_v11 = vld [vmem:[%s1010_s3 + $0x10] sm:$0xff]  ;;  %s543_s13 = sshll.u32 %s833_s10, 4  ;;  %s544_s13 = int_to_ptr.vmem [resolvable:$true] %s543_s13 }
  0x29   :  { %673 = vmatprep.subr.bf16.mxu0 %v672_v3  ;;  %v187_v9 = vld [vmem:[%s1010_s3 + $0x8] sm:$0xff]  ;;  %v189_v12 = vld [vmem:[%s1010_s3 + $0x18] sm:$0xff]  ;;  %v190_v14 = vld [vmem:[%s1010_s3 + $0x20] sm:$0xff]  ;;  %s801_s14 = scalar_lea.vmem %s544_s13, 256  ;;  %p806_p3 = scmp.lt.s32.totalorder %s544_s13, %s544_s13 }
  0x2a   :  { %675 = vmatpush3.bf16.msra.mxu0 %v672_v3  ;;  %v680_v10 = vpack.c.bf16 %v187_v9, %v186_v8  ;;  %v684_v13 = vpack.c.bf16 %v189_v12, %v188_v11  ;;  %v191_v15 = vld [vmem:[%s1010_s3 + $0x28] sm:$0xff]  ;;  %v192_v17 = vld [vmem:[%s1010_s3 + $0x30] sm:$0xff]  ;;  %v193_v18 = vld [vmem:[%s1010_s3 + $0x38] sm:$0xff]  ;;  %p802_p2 = scmp.ne.s32.totalorder %s544_s13, %s801_s14  ;;  %p807_p4 = scmp.lt.s32.totalorder %s801_s14, %s801_s14 }
  0x2b   :  { %677 = vmatprep.subr.bf16.mxu0 %v676_v6  ;;  %v688_v16 = vpack.c.bf16 %v191_v15, %v190_v14  ;;  %v692_v19 = vpack.c.bf16 %v193_v18, %v192_v17  ;;  %v556_v20 = vld [vmem:[%s1009_s2] ss:$0 sm:$0xff]  ;;  %v313_v53 = vld [vmem:[#allocation5] sm:$0xff]  ;;  %v314_v54 = vld [vmem:[#allocation5 + $0x8] sm:$0xff] }
  0x2c   :  { %681 = vmatprep.subr.bf16.mxu1 %v680_v10  ;;  %v696_v55 = vpack.c.bf16 %v314_v54, %v313_v53  ;;  %v315_v56 = vld [vmem:[#allocation5 + $0x10] sm:$0xff]  ;;  %v316_v57 = vld [vmem:[#allocation5 + $0x18] sm:$0xff]  ;;  %v317_v59 = vld [vmem:[#allocation5 + $0x20] sm:$0xff]  ;;  %p808_p5 = por %p807_p4, %p806_p3 }
  0x2d   :  { %683 = vmatpush3.bf16.msra.mxu1 %v680_v10  ;;  %v700_v58 = vpack.c.bf16 %v316_v57, %v315_v56  ;;  %v318_v60 = vld [vmem:[#allocation5 + $0x28] sm:$0xff]  ;;  %v319_v62 = vld [vmem:[#allocation5 + $0x30] sm:$0xff]  ;;  %v320_v63 = vld [vmem:[#allocation5 + $0x38] sm:$0xff] }
  0x2e   :  { %679 = vmatpush3.bf16.msra.mxu0 %v676_v6  ;;  %685 = vmatprep.subr.bf16.mxu1 %v684_v13  ;;  %v704_v61 = vpack.c.bf16 %v318_v60, %v317_v59  ;;  %v708_v0 = vpack.c.bf16 %v320_v63, %v319_v62  ;;  %v559_v1 = vld [vmem:[%s1011_s4] ss:$0 sm:$0xff]  ;;  %p809_p6 = pnand %p808_p5, %p802_p2 }
  0x2f   :  { %697 = vmatprep.subr.bf16.mxu0 %v696_v55 }
  0x31   :  { %613 = vmatmul.mubr.msk.f32.vlgmr.msra.gmra.mrb[0].mxu0 %vm74_vm0, %v62_v7  ;;  %687 = vmatpush3.bf16.msra.mxu1 %v684_v13 }
  0x32   :  { %689 = vmatprep.subr.bf16.mxu1 %v688_v16  ;;  %699 = vmatpush3.bf16.msra.mxu0 %v696_v55 }
  0x33   :  { %701 = vmatprep.subr.bf16.mxu0 %v700_v58 }
  0x35   :  { %691 = vmatpush3.bf16.msra.mxu1 %v688_v16 }
  0x36   :  { %693 = vmatprep.subr.bf16.mxu1 %v692_v19  ;;  %703 = vmatpush3.bf16.msra.mxu0 %v700_v58 }
  0x37   :  { %705 = vmatprep.subr.bf16.mxu0 %v704_v61 }
  0x39   :  { %695 = vmatpush3.bf16.msra.mxu1 %v692_v19 }
  0x3a   :  { %707 = vmatpush3.bf16.msra.mxu0 %v704_v61 }
  0x3b   :  { %709 = vmatprep.subr.bf16.mxu0 %v708_v0 }
  0x3e   :  { %711 = vmatpush3.bf16.msra.mxu0 %v708_v0 }
 0x104   :  { %v614_v21 = vpop.f32.mrb[0].mxu0 }
 0x105   :  { %v153_v22 = vadd.f32 %v614_v21, %v556_v20  ;;  %v147_v23 = vpop.f32.mrb[1].mxu0 }
 0x106   :  { %v148_v24 = vadd.f32 %v556_v20, %v147_v23 }
 0x107   :  { %v159_v25 = vand.u32 2147483647, %v153_v22  ;;  %v157_v49 = vmax.f32 %v153_v22, 0.0 }
 0x108   :  { %v158_v26 = vand.u32 2147483647, %v148_v24  ;;  %v156_v48 = vmax.f32 %v148_v24, 0.0 }
 0x109   :  { %v161_v27 = vsub.f32 0.0, %v159_v25 }
 0x10a   :  { %v160_v28 = vsub.f32 0.0, %v158_v26 }
 0x10b   :  { %v164_v29 = vmul.f32 1.442695, %v161_v27 }
 0x10c   :  { %v162_v30 = vmul.f32 1.442695, %v160_v28 }
 0x10d   :  { %733 = vpow2.f32 %v164_v29 }
 0x10e   :  { %735 = vpow2.f32 %v162_v30 }
 0x117   :  { %v734_v31 = vpop.eup %733 }
 0x118   :  { %v736_v32 = vpop.eup %735  ;;  %v175_v33 = vadd.f32 1.0, %v734_v31  ;;  %v178_v35 = vmul.f32 -0.5, %v734_v31  ;;  %v181_v38 = vand.u32 2147483647, %v734_v31 }
 0x119   :  { %v166_v34 = vadd.f32 1.0, %v736_v32  ;;  %v169_v36 = vmul.f32 -0.5, %v736_v32  ;;  %v172_v40 = vand.u32 2147483647, %v736_v32 }
 0x11a   :  { %737 = vlog2.f32 %v175_v33  ;;  %v179_v37 = vadd.f32 1.0, %v178_v35  ;;  %vm182_vm1 = vcmp.lt.f32.partialorder %v181_v38, 0.0004427343  ;;  %v440_v35 = vld [vmem:[%s1014_s7 + $0x8] sm:$0xff]  ;;  %v442_v38 = vld [vmem:[%s1014_s7 + $0x18] sm:$0xff] }
 0x11b   :  { %739 = vlog2.f32 %v166_v34  ;;  %v170_v39 = vadd.f32 1.0, %v169_v36  ;;  %vm173_vm2 = vcmp.lt.f32.partialorder %v172_v40, 0.0004427343  ;;  %v439_v34 = vld [vmem:[%s1014_s7] sm:$0xff] }
 0x11c   :  { %v180_v44 = vmul.f32 %v734_v31, %v179_v37  ;;  %v712_v36 = vpack.c.bf16 %v440_v35, %v439_v34  ;;  %v441_v37 = vld [vmem:[%s1014_s7 + $0x10] sm:$0xff]  ;;  %v443_v40 = vld [vmem:[%s1014_s7 + $0x20] sm:$0xff] }
 0x11d   :  { %v171_v46 = vmul.f32 %v736_v32, %v170_v39  ;;  %v716_v39 = vpack.c.bf16 %v442_v38, %v441_v37 }
 0x11e   :  { %713 = vmatprep.subr.bf16.mxu1 %v712_v36 }
 0x124   :  { %v738_v41 = vpop.eup %737 }
 0x125   :  { %v740_v42 = vpop.eup %739  ;;  %v177_v43 = vmul.f32 0.6931472, %v738_v41  ;;  %v444_v41 = vld [vmem:[%s1014_s7 + $0x28] sm:$0xff] }
 0x126   :  { %v168_v45 = vmul.f32 0.6931472, %v740_v42  ;;  %v720_v42 = vpack.c.bf16 %v444_v41, %v443_v40 }
 0x127   :  { %v183_v47 = vsel %vm182_vm1, %v180_v44, %v177_v43  ;;  %v445_v43 = vld [vmem:[%s1014_s7 + $0x30] sm:$0xff]  ;;  %v446_v44 = vld [vmem:[%s1014_s7 + $0x38] sm:$0xff] }
 0x128   :  { %v174_v50 = vsel %vm173_vm2, %v171_v46, %v168_v45  ;;  %v185_v52 = vadd.f32 %v183_v47, %v157_v49  ;;  %v724_v45 = vpack.c.bf16 %v446_v44, %v445_v43  ;;  %v562_v46 = vld [vmem:[%s1013_s6] ss:$0 sm:$0xff] }
 0x129   :  { %v184_v51 = vadd.f32 %v174_v50, %v156_v48 }
 0x12b   :  { %631 = vmatprep.mubr.msk.f32.mxu1 %vm201_vm3, %v184_v51 }
 0x12c   :  { %632 = vmatmul.mubr.msk.f32.vlgmr.msra.gmra.mrb[0].mxu1 %vm201_vm3, %v185_v52 }
 0x12d   :  { %715 = vmatpush3.bf16.msra.mxu1 %v712_v36 }
 0x12e   :  { %717 = vmatprep.subr.bf16.mxu1 %v716_v39 }
 0x131   :  { %719 = vmatpush3.bf16.msra.mxu1 %v716_v39 }
 0x132   :  { %721 = vmatprep.subr.bf16.mxu1 %v720_v42 }
 0x135   :  { %723 = vmatpush3.bf16.msra.mxu1 %v720_v42 }
 0x136   :  { %725 = vmatprep.subr.bf16.mxu1 %v724_v45 }
 0x139   :  { %727 = vmatpush3.bf16.msra.mxu1 %v724_v45 }
 0x1ff   :  { %v633_v2 = vpop.f32.mrb[0].mxu1 }
 0x200   :  { %v280_v3 = vadd.f32 %v633_v2, %v559_v1  ;;  %v274_v4 = vpop.f32.mrb[1].mxu1 }
 0x201   :  { %v275_v5 = vadd.f32 %v559_v1, %v274_v4 }
 0x202   :  { %v286_v6 = vand.u32 2147483647, %v280_v3  ;;  %v284_v30 = vmax.f32 %v280_v3, 0.0 }
 0x203   :  { %v285_v7 = vand.u32 2147483647, %v275_v5  ;;  %v283_v29 = vmax.f32 %v275_v5, 0.0 }
 0x204   :  { %v288_v8 = vsub.f32 0.0, %v286_v6 }
 0x205   :  { %v287_v9 = vsub.f32 0.0, %v285_v7 }
 0x206   :  { %v291_v10 = vmul.f32 1.442695, %v288_v8 }
 0x207   :  { %v289_v11 = vmul.f32 1.442695, %v287_v9 }
 0x208   :  { %741 = vpow2.f32 %v291_v10 }
 0x209   :  { %743 = vpow2.f32 %v289_v11 }
 0x212   :  { %v742_v12 = vpop.eup %741 }
 0x213   :  { %v744_v13 = vpop.eup %743  ;;  %v302_v14 = vadd.f32 1.0, %v742_v12  ;;  %v305_v16 = vmul.f32 -0.5, %v742_v12  ;;  %v308_v19 = vand.u32 2147483647, %v742_v12 }
 0x214   :  { %v293_v15 = vadd.f32 1.0, %v744_v13  ;;  %v296_v17 = vmul.f32 -0.5, %v744_v13  ;;  %v299_v21 = vand.u32 2147483647, %v744_v13 }
 0x215   :  { %745 = vlog2.f32 %v302_v14  ;;  %v306_v18 = vadd.f32 1.0, %v305_v16  ;;  %vm309_vm4 = vcmp.lt.f32.partialorder %v308_v19, 0.0004427343 }
 0x216   :  { %747 = vlog2.f32 %v293_v15  ;;  %v297_v20 = vadd.f32 1.0, %v296_v17  ;;  %vm300_vm5 = vcmp.lt.f32.partialorder %v299_v21, 0.0004427343  ;;  %v565_v15 = vld [vmem:[%s1015_s8] ss:$0 sm:$0xff] }
 0x217   :  { %v307_v25 = vmul.f32 %v742_v12, %v306_v18 }
 0x218   :  { %v298_v27 = vmul.f32 %v744_v13, %v297_v20 }
 0x21f   :  { %v746_v22 = vpop.eup %745 }
 0x220   :  { %v748_v23 = vpop.eup %747  ;;  %v304_v24 = vmul.f32 0.6931472, %v746_v22 }
 0x221   :  { %v295_v26 = vmul.f32 0.6931472, %v748_v23 }
 0x222   :  { %v310_v28 = vsel %vm309_vm4, %v307_v25, %v304_v24 }
 0x223   :  { %v301_v31 = vsel %vm300_vm5, %v298_v27, %v295_v26  ;;  %v312_v33 = vadd.f32 %v310_v28, %v284_v30 }
 0x224   :  { %v311_v32 = vadd.f32 %v301_v31, %v283_v29 }
 0x226   :  { %650 = vmatprep.mubr.msk.f32.mxu0 %vm201_vm3, %v311_v32 }
 0x227   :  { %651 = vmatmul.mubr.msk.f32.vlgmr.msra.gmra.mrb[2].mxu0 %vm201_vm3, %v312_v33 }
 0x2fa   :  { %v652_v47 = vpop.f32.mrb[2].mxu0 }
 0x2fb   :  { %v406_v48 = vadd.f32 %v652_v47, %v562_v46  ;;  %v400_v49 = vpop.f32.mrb[3].mxu0 }
 0x2fc   :  { %v401_v50 = vadd.f32 %v562_v46, %v400_v49 }
 0x2fd   :  { %v412_v51 = vand.u32 2147483647, %v406_v48  ;;  %v410_v11 = vmax.f32 %v406_v48, 0.0 }
 0x2fe   :  { %v411_v52 = vand.u32 2147483647, %v401_v50  ;;  %v409_v10 = vmax.f32 %v401_v50, 0.0 }
 0x2ff   :  { %v414_v53 = vsub.f32 0.0, %v412_v51 }
 0x300   :  { %v413_v54 = vsub.f32 0.0, %v411_v52 }
 0x301   :  { %v417_v55 = vmul.f32 1.442695, %v414_v53 }
 0x302   :  { %v415_v56 = vmul.f32 1.442695, %v413_v54 }
 0x303   :  { %749 = vpow2.f32 %v417_v55 }
 0x304   :  { %751 = vpow2.f32 %v415_v56 }
 0x30d   :  { %v750_v57 = vpop.eup %749 }
 0x30e   :  { %v752_v58 = vpop.eup %751  ;;  %v428_v59 = vadd.f32 1.0, %v750_v57  ;;  %v431_v61 = vmul.f32 -0.5, %v750_v57  ;;  %v434_v0 = vand.u32 2147483647, %v750_v57 }
 0x30f   :  { %v419_v60 = vadd.f32 1.0, %v752_v58  ;;  %v422_v62 = vmul.f32 -0.5, %v752_v58  ;;  %v425_v2 = vand.u32 2147483647, %v752_v58 }
 0x310   :  { %753 = vlog2.f32 %v428_v59  ;;  %v432_v63 = vadd.f32 1.0, %v431_v61  ;;  %vm435_vm6 = vcmp.lt.f32.partialorder %v434_v0, 0.0004427343 }
 0x311   :  { %755 = vlog2.f32 %v419_v60  ;;  %v423_v1 = vadd.f32 1.0, %v422_v62  ;;  %vm426_vm7 = vcmp.lt.f32.partialorder %v425_v2, 0.0004427343 }
 0x312   :  { %v433_v6 = vmul.f32 %v750_v57, %v432_v63 }
 0x313   :  { %v424_v8 = vmul.f32 %v752_v58, %v423_v1 }
 0x31a   :  { %v754_v3 = vpop.eup %753 }
 0x31b   :  { %v756_v4 = vpop.eup %755  ;;  %v430_v5 = vmul.f32 0.6931472, %v754_v3 }
 0x31c   :  { %v421_v7 = vmul.f32 0.6931472, %v756_v4 }
 0x31d   :  { %v436_v9 = vsel %vm435_vm6, %v433_v6, %v430_v5 }
 0x31e   :  { %v427_v12 = vsel %vm426_vm7, %v424_v8, %v421_v7  ;;  %v438_v14 = vadd.f32 %v436_v9, %v410_v11 }
 0x31f   :  { %v437_v13 = vadd.f32 %v427_v12, %v409_v10 }
 0x321   :  { %669 = vmatprep.mubr.msk.f32.mxu1 %vm201_vm3, %v437_v13 }
 0x322   :  { %670 = vmatmul.mubr.msk.f32.vlgmr.msra.gmra.mrb[2].mxu1 %vm201_vm3, %v438_v14 }
 0x3f5   :  { %v671_v16 = vpop.f32.mrb[2].mxu1 }
 0x3f6   :  { %v532_v17 = vadd.f32 %v671_v16, %v565_v15  ;;  %v526_v18 = vpop.f32.mrb[3].mxu1 }
 0x3f7   :  { %v527_v19 = vadd.f32 %v565_v15, %v526_v18 }
 0x3f8   :  { %537 = vst.msk [vmem:[#allocation7 + $0x8] sm:$0xff] %vm535_vm8, %v532_v17 }
 0x3f9   :  { %536 = vst.msk [vmem:[#allocation7] sm:$0xff] %vm535_vm8, %v527_v19 }
 0x3fa   :  { %812 = shalt.err (!%p809_p6)
}
 0x3fb   :  { %s813_s8 = scalar_lea.hbm %s1016_s9, 256 }
 0x3fc   :  { %p814_p7 = scmp.ne.s32.totalorder %s1016_s9, %s813_s8  ;;  %p817_p8 = scmp.lt.u32.totalorder %s813_s8, %s1016_s9 }
 0x3fe   :  { %p819_p9 = pnand %p817_p8, %p814_p7 }
 0x400   :  { %822 = shalt.err (!%p819_p9)
}
 0x401   :  { %549 = dma.vmem_to_hbm [thread:$0]  %s544_s13, 256, %s1016_s9, [#allocation4], %s830_s19, %s830_s19, %s831_s20  }
 0x402   :  { %827 = dma.done.wait [#allocation4], 256  }
 0x403   :  { %828 = vsyncadd [#allocation4], 4294967040 }
 0x404   :  { %553 = vsyncpa [#allocation3], 1 }
 0x405   :  { %554 = vsyncpa [#allocation6], 1 }
 0x406   :  { %555 = vsyncpa [#allocation4], 1 }

</bundles_post_ra>
